<compile_context>
chip_gen: v7x
topology: tpu7x:2x2x1
jax: 0.10.0
libtpu: 0.0.40
codegen_flags: <defaults>
</compile_context>

<pallas_src>
import functools

import jax
import jax.numpy as jnp
from jax.experimental import pallas as pl
from jax.experimental.pallas import tpu as pltpu


def _normalize_pow2_kernel(x_ref, o_ref):
    # Block: (1, C, T_HW).  Reduce over the channel axis (axis=1).
    x = x_ref[...].astype(jnp.float32)
    ssq = jnp.sum(x * x, axis=1, keepdims=True)          # (1, 1, T_HW)  VPU
    norm = jnp.sqrt(ssq)                                  # (1, 1, T_HW)  EUP (HW only)
    inv = 1.0 / (norm + 1e-07)                            # eps added AFTER the root
    o_ref[...] = (x * inv).astype(o_ref.dtype)            # broadcast VPU multiply


def _normalize_generic_kernel(x_ref, o_ref, *, power: float):
    # Generic L-p path (non-default powers).
    x = x_ref[...].astype(jnp.float32)
    xp = jnp.power(x, power)
    norm = jnp.power(jnp.sum(xp, axis=1, keepdims=True), 1.0 / power)
    inv = 1.0 / (norm + 1e-07)
    o_ref[...] = (x * inv).astype(o_ref.dtype)


def _pick_hw_tile(hw: int, c: int, itemsize: int,
                  vmem_budget_bytes: int = 12 * 1024 * 1024,
                  max_tile: int = 2048) -> int:
    """Largest lane tile that (a) is a multiple of 128 and divides HW,
    (b) keeps the double-buffered in+out footprint under a conservative
    VMEM budget (safe for v5e's 16 MiB scoped default and v7x's 64 MiB),
    (c) is capped at `max_tile` lanes.  Falls back to the full extent when
    HW is not lane-aligned (a block equal to the full dim is always legal)."""
    if hw % 128 != 0:
        return hw
    per_lane_bytes = 2 * 2 * c * itemsize  # (in + out) x double-buffer x C
    cap = min(max_tile, max(128, vmem_budget_bytes // max(per_lane_bytes, 1)))
    cap -= cap % 128
    cap = max(cap, 128)
    if hw <= cap:
        return hw
    t = cap
    while t >= 128:
        if hw % t == 0:
            return t
        t -= 128
    return hw


def normalize(x: jax.Array, power: float = 2.0) -> jax.Array:
    """L-p normalize over the channel axis of an NCHW tensor."""
    B, C, H, W = x.shape
    HW = H * W
    x_flat = x.reshape(B, C, HW)

    itemsize = jnp.dtype(x.dtype).itemsize
    t_hw = _pick_hw_tile(HW, C, itemsize)
    grid = (B, HW // t_hw)

    if float(power) == 2.0:
        kernel = _normalize_pow2_kernel
    else:
        kernel = functools.partial(_normalize_generic_kernel, power=float(power))

    cost = pl.CostEstimate(
        flops=3 * B * C * HW,                      # square + reduce + scale
        transcendentals=2 * B * HW,                # sqrt + reciprocal per pixel
        bytes_accessed=2 * B * C * HW * itemsize,  # read x + write out
    )

    out_flat = pl.pallas_call(
        kernel,
        out_shape=jax.ShapeDtypeStruct((B, C, HW), x.dtype),
        grid_spec=pltpu.PrefetchScalarGridSpec(
            num_scalar_prefetch=0,
            grid=grid,
            in_specs=[pl.BlockSpec((1, C, t_hw), lambda b, h: (b, 0, h))],
            out_specs=pl.BlockSpec((1, C, t_hw), lambda b, h: (b, 0, h)),
        ),
        compiler_params=pltpu.CompilerParams(
            dimension_semantics=("parallel", "parallel"),
        ),
        cost_estimate=cost,
    )(x_flat)

    return out_flat.reshape(B, C, H, W)


def _reference(x: jax.Array, power: float = 2.0) -> jax.Array:
    xf = x.astype(jnp.float32)
    norm = jnp.power(jnp.sum(jnp.power(xf, power), axis=1, keepdims=True),
                     1.0 / power)
    return (xf / (norm + 1e-07)).astype(x.dtype)


if __name__ == "__main__":
    key = jax.random.PRNGKey(0)
    # Small NCHW input consistent with the module's forward pass.
    x = jax.random.normal(key, (2, 4, 16, 16), dtype=jnp.float32)

    out = normalize(x, power=2.0)
    out = jax.block_until_ready(out)

    ref = _reference(x, power=2.0)
    assert out.shape == x.shape
    assert jnp.allclose(out, ref, atol=1e-5, rtol=1e-5), "mismatch vs reference"

    print("KERNEL_OK")
</pallas_src>

<mosaic_0001>
module attributes {stable_mosaic.version = 11 : i64} {
  func.func @_normalize_pow2_kernel(%arg0: i32, %arg1: i32, %arg2: memref<1x4x256xf32, #tpu.memory_space<vmem>>, %arg3: memref<1x4x256xf32, #tpu.memory_space<vmem>>) attributes {dimension_semantics = [#tpu.dimension_semantics<parallel>, #tpu.dimension_semantics<parallel>], iteration_bounds = array<i64: 2, 1>, scalar_prefetch = 0 : i64, scratch_operands = 0 : i64, tpu.core_type = #tpu.core_type<tc>, window_params = [{transform_indices = @transform_0, window_bounds = array<i64: 1, 4, 256>}, {transform_indices = @transform_1, window_bounds = array<i64: 1, 4, 256>}]} {
    %c0 = arith.constant 0 : index
    %c0_0 = arith.constant 0 : index
    %c0_1 = arith.constant 0 : index
    %0 = vector.load %arg2[%c0, %c0_0, %c0_1] : memref<1x4x256xf32, #tpu.memory_space<vmem>>, vector<1x4x256xf32>
    %1 = arith.mulf %0, %0 : vector<1x4x256xf32>
    %cst = arith.constant dense<0.000000e+00> : vector<1x256xf32>
    %2 = vector.multi_reduction <add>, %1, %cst [1] : vector<1x4x256xf32> to vector<1x256xf32>
    %3 = vector.shape_cast %2 : vector<1x256xf32> to vector<1x1x256xf32>
    %4 = math.sqrt %3 : vector<1x1x256xf32>
    %cst_2 = arith.constant 1.000000e-07 : f32
    %5 = vector.broadcast %cst_2 : f32 to vector<1x1x256xf32>
    %6 = arith.addf %4, %5 : vector<1x1x256xf32>
    %cst_3 = arith.constant 1.000000e+00 : f32
    %7 = vector.broadcast %cst_3 : f32 to vector<1x1x256xf32>
    %8 = arith.divf %7, %6 : vector<1x1x256xf32>
    %9 = vector.broadcast %8 : vector<1x1x256xf32> to vector<1x4x256xf32>
    %10 = arith.mulf %0, %9 : vector<1x4x256xf32>
    %c0_4 = arith.constant 0 : index
    %c0_5 = arith.constant 0 : index
    %c0_6 = arith.constant 0 : index
    %11 = vector.load %arg3[%c0_4, %c0_5, %c0_6] : memref<1x4x256xf32, #tpu.memory_space<vmem>>, vector<1x4x256xf32>
    tpu.vector_store %arg3[%c0_4, %c0_5, %c0_6], %10 {strides = array<i32>} : memref<1x4x256xf32, #tpu.memory_space<vmem>>, vector<1x4x256xf32>,
    return
  }
  func.func @transform_0(%arg0: i32, %arg1: i32) -> (i32, i32, i32) {
    %c0_i32 = arith.constant 0 : i32
    %c0_i32_0 = arith.constant 0 : i32
    return %arg0, %c0_i32, %arg1 : i32, i32, i32
  }
  func.func @transform_1(%arg0: i32, %arg1: i32) -> (i32, i32, i32) {
    %c0_i32 = arith.constant 0 : i32
    %c0_i32_0 = arith.constant 0 : i32
    return %arg0, %c0_i32, %arg1 : i32, i32, i32
  }
}

</mosaic_0001>

<bundles_post_ra>
// kernel: tpu_custom_call.1
= control target key start
LH: loop header
LB: loop body
LE: loop exit
PB: predicated region body
PF: predicated region fallthrough
CT: control target
= control target key end

     0   :  { %6 = vsyncpa [#allocation3], 0  ;;  %s689_s0 = inlined_call_operand.hbm [shape: f32[2,4,256], index: 0, kind: input, shape index: {}]   ;;  %s690_s1 = inlined_call_operand.hbm [shape: f32[2,4,256], index: 1, kind: output, shape index: {}]  }
   0x1   :  { %8 = vsyncpa [#allocation3 + $0x1], 0 }
   0x2   :  { %9 = vsyncpa [#allocation4], 0 }
   0x3   :  { %11 = vsyncpa [#allocation4 + $0x1], 0  ;;  %s513_s6 = smov 0   ;;  %s515_s7 = smov 0  }
   0x4   :  { %s517_s8 = smov 0   ;;  %s519_s9 = smov 0  }
   0x5   :  { %s521_s10 = smov 0   ;;  %s523_s11 = smov 0  }
   0x6 LB: > { %s300_s12 = sadd.s32 4294967295, %s499_s11   ;;  %s301_s13 = sadd.s32 4294967294, %s499_s11   ;;  %s499_s11 = sphi %s523_s11, %s17_s11   ;;  %s495_s10 = sphi %s521_s10, %s706_s10   ;;  %s491_s9 = sphi %s519_s9, %s705_s9   ;;  %s487_s8 = sphi %s517_s8, %s704_s8   ;;  %s483_s7 = sphi %s515_s7, %s703_s7   ;;  %s479_s6 = sphi %s513_s6, %s702_s6  }
   0x7   : > { %s29_s14 = sadd.s32 1, %s495_s10  ;;  %s38_s15 = sadd.s32 1, %s487_s8 }
   0x8   : > { %p31_p0 = scmp.ge.s32.totalorder %s29_s14, 2  ;;  %p45_p1 = scmp.ne.s32.totalorder %s487_s8, %s483_s7 }
   0x9   : > { %p46_p2 = scmp.eq.s32.totalorder %s499_s11, 0  ;;  %p51_p3 = scmp.ne.s32.totalorder %s483_s7, %s479_s6 }
   0xa   : > { %s708_s14 = smov (%p31_p0, %s29_s14), 0  ;;  %p52_p5 = scmp.eq.s32.totalorder %s300_s12, 0 }
   0xb   : > { %p554_p4 = por %p46_p2, %p45_p1  ;;  %s33_s17 = ssub.s32 %s495_s10, %s708_s14 }
   0xc   : > { %p77_p6 = scmp.eq.s32.totalorder %s300_s12, 1  ;;  %p36_p7 = scmp.eq.s32.totalorder %s33_s17, 0 }
   0xd   : > { %p560_p8 = por %p52_p5, %p51_p3  ;;  %p83_p10 = scmp.eq.s32.totalorder %s301_s13, 1 }
   0xe   : > { %p564_p9 = por %p77_p6, %p45_p1  ;;  %p329_p13 = scmp.lt.s32.totalorder %s499_s11, 2 }
   0xf   : > { %s569_s20 = scalar_select %p36_p7, %s487_s8, %s38_s15  }
  0x10   : > { %s694_s19 = scalar_select %p564_p9, 1, 0 }
  0x11   : > { %p571_p11 = por %p83_p10, %p51_p3  ;;  %s103_s22 = sand.u32 1, %s487_s8  }
  0x12   : > { %s304_s23 = sshll.u32 %s103_s22, 3  ;;  %s315_s24 = sshll.u32 %s495_s10, 7 }
  0x13   : > { %s695_s21 = scalar_select %p571_p11, 1, 0 }
  0x14   : > { %s582_s27 = scalar_lea.hbm %s689_s0, %s315_s24  ;;  %s107_s28 = scalar_lea.vmem [#allocation2], %s304_s23 }
  0x15   : > { %s117_s29 = sshll.u32 %s107_s28, 4  ;;  %p588_p0 = pnand %p329_p13, %p554_p4  ;;  %s584_s29 = int_to_ptr.vmem [resolvable:$true] %s117_s29 }
  0x16   : > { %s104_s2 = scalar_lea.sflag [#allocation3], %s103_s22  ;;  %s387_s3 = scalar_lea.hbm %s582_s27, 128 }
  0x17   : > { %p388_p3 = scmp.ne.s32.totalorder %s582_s27, %s387_s3  ;;  %p389_p5 = pneg %p588_p0 }
  0x18   : > { %s392_s12 = scalar_lea.hbm %s689_s0, 256  ;;  %p393_p4 = scmp.lt.u32.totalorder %s582_s27, %s689_s0 }
  0x19   : > { %p390_p6 = pnand %p389_p5, %p388_p3  ;;  %p394_p10 = scmp.lt.u32.totalorder %s392_s12, %s387_s3 }
  0x1a   : > { %p396_p12 = scmp.lt.u32.totalorder %s387_s3, %s582_s27 }
  0x1b   : > { %p391_p7 = pneg %p390_p6  ;;  %p395_p13 = por %p394_p10, %p393_p4 }
  0x1d   : > { %p397_p1 = por %p396_p12, %p395_p13 }
  0x1f   : > { %p398_p2 = pnand %p397_p1, %p391_p7 }
  0x21   : > { %401 = shalt.err (!%p398_p2)
}
  0x22   : > { %s402_s16 = scalar_lea.vmem %s584_s29, 128  ;;  %s501_s17 = smov [#allocation2]  }
  0x23   : > { %p403_p3 = scmp.ne.s32.totalorder %s584_s29, %s402_s16  ;;  %s407_s22 = sshll.u32 %s501_s17, 4  ;;  %s408_s22 = int_to_ptr.vmem [resolvable:$false] %s407_s22 }
  0x24   : > { %s409_s23 = scalar_lea.vmem %s408_s22, 256  ;;  %p410_p9 = scmp.lt.s32.totalorder %s584_s29, %s408_s22 }
  0x25   : > { %p405_p6 = pnand %p403_p3, %p389_p5  ;;  %p411_p4 = scmp.lt.s32.totalorder %s409_s23, %s402_s16 }
  0x27   : > { %p406_p11 = pneg %p405_p6  ;;  %p412_p10 = por %p411_p4, %p410_p9 }
  0x29   : > { %p413_p12 = pnand %p412_p10, %p406_p11 }
  0x2b   : > { %416 = shalt.err (!%p413_p12)
}
  0x2c   : > { %324 = dma.hbm_to_vmem [thread:$0]  (!%p588_p0), %s582_s27, 128, %s584_s29, %s104_s2  }
  0x2d   : > { %p697_p1 = scmp.lt.s32.totalorder %s499_s11, 3  ;;  %p698_p2 = scmp.ge.s32.totalorder %s499_s11, 1 }
  0x2f   : > { %p123_p5 = pnand %p698_p2, %p697_p1 }
  0x30   : > { %s624_s24 = sand.u32 (!%p123_p5), 1, %s483_s7  }
  0x31   : > { %126 = sbr.rel (%p123_p5) target bundleno = 121 (0x79), region = 24  ;;  %s308_s25 = sshll.u32 (!%p123_p5), %s624_s24, 3 }
  0x32   : > { %s129_s26 = scalar_lea.sflag (!%p123_p5), [#allocation3], %s624_s24  ;;  %s132_s28 = scalar_lea.vmem (!%p123_p5), [#allocation2], %s308_s25 }
  0x38   : > { %470 = dma.done.wait (%p560_p8), %s129_s26, 128  }
  0x39   : > { %472 = vsyncadd (%p560_p8), %s129_s26, 4294967168  ;;  %v153_v0 = vld [vmem:[%s132_s28] sm:$0xff]  ;;  %vm158_vm0 = vcmask 1043456   ;;  %s150_s18 = scalar_lea.vmem [#allocation5], %s308_s25  ;;  %s316_s29 = sshll.u32 %s491_s9, 7 }
  0x3a   : > { %v154_v1 = vmul.f32 %v153_v0, %v153_v0  ;;  %s216_s27 = sshll.u32 %s150_s18, 4  ;;  %s642_s3 = scalar_lea.hbm %s690_s1, %s316_s29  ;;  %s637_s27 = int_to_ptr.vmem [resolvable:$true] %s216_s27 }
  0x3b   : > { %s200_s4 = scalar_lea.sflag [#allocation4], %s624_s24  ;;  %s417_s5 = scalar_lea.vmem %s637_s27, 128 }
  0x3c   : > { %v156_v2 = vcombine.high %v154_v1, %v154_v1  ;;  %v159_v3 = vsel %vm158_vm0, %v154_v1, 0.0  ;;  %p418_p8 = scmp.ne.s32.totalorder %s637_s27, %s417_s5  ;;  %p699_p9 = scmp.ne.s32.totalorder %s694_s19, 0 }
  0x3d   : > { %v160_v4 = vrot.slane %v159_v3, 4  ;;  %s502_s9 = smov [#allocation5]  }
  0x3e   : > { %v166_v5 = vsel %vm158_vm0, %v156_v2, 0.0  ;;  %p419_p11 = pnand %p418_p8, %p699_p9  ;;  %s421_s12 = sshll.u32 %s502_s9, 4  ;;  %s422_s12 = int_to_ptr.vmem [resolvable:$false] %s421_s12 }
  0x3f   : > { %v161_v6 = vadd.f32 %v160_v4, %v159_v3  ;;  %v167_v7 = vrot.slane %v166_v5, 4  ;;  %s423_s13 = scalar_lea.vmem %s422_s12, 256  ;;  %p424_p7 = scmp.lt.s32.totalorder %s637_s27, %s422_s12 }
  0x40   : > { %p420_p0 = pneg %p419_p11  ;;  %p425_p13 = scmp.lt.s32.totalorder %s423_s13, %s417_s5 }
  0x41   : > { %v162_v8 = vrot.slane %v161_v6, 2  ;;  %v168_v9 = vadd.f32 %v167_v7, %v166_v5 }
  0x42   : > { %p426_p3 = por %p425_p13, %p424_p7 }
  0x43   : > { %v163_v10 = vadd.f32 %v162_v8, %v161_v6  ;;  %v169_v11 = vrot.slane %v168_v9, 2 }
  0x44   : > { %p427_p6 = pnand %p426_p3, %p420_p0 }
  0x45   : > { %v164_v12 = vrot.slane %v163_v10, 1  ;;  %v170_v13 = vadd.f32 %v169_v11, %v168_v9 }
  0x47   : > { %v165_v14 = vadd.f32 %v164_v12, %v163_v10  ;;  %v171_v15 = vrot.slane %v170_v13, 1 }
  0x49   : > { %v172_v16 = vadd.f32 %v171_v15, %v170_v13  ;;  %379 = vrsqrt.f32 %v165_v14  ;;  %vm175_vm1 = vcmp.eq.f32.partialorder %v165_v14, inf  ;;  %v178_v18 = vand.u32 2147483648, %v165_v14 }
  0x4a   : > { %vm177_vm2 = vcmp.eq.f32.partialorder %v165_v14, 0.0 }
  0x4b   : > { %381 = vrsqrt.f32 %v172_v16  ;;  %vm182_vm3 = vcmp.eq.f32.partialorder %v172_v16, inf  ;;  %v185_v21 = vand.u32 2147483648, %v172_v16  ;;  %vm184_vm4 = vcmp.eq.f32.partialorder %v172_v16, 0.0 }
  0x53   : > { %v380_v17 = vpop.eup %379 }
  0x54   : > { %v174_v19 = vmul.f32 %v380_v17, %v165_v14 }
  0x55   : > { %v382_v20 = vpop.eup %381 }
  0x56   : > { %v176_v22 = vsel %vm175_vm1, %v165_v14, %v174_v19  ;;  %v181_v23 = vmul.f32 %v382_v20, %v172_v16 }
  0x57   : > { %v179_v24 = vsel %vm177_vm2, %v178_v18, %v176_v22 }
  0x58   : > { %v183_v25 = vsel %vm182_vm3, %v172_v16, %v181_v23  ;;  %v187_v26 = vadd.f32 1e-07, %v179_v24 }
  0x59   : > { %v186_v27 = vsel %vm184_vm4, %v185_v21, %v183_v25 }
  0x5a   : > { %v188_v28 = vadd.f32 1e-07, %v186_v27  ;;  %383 = vrcp.f32 %v187_v26 }
  0x5c   : > { %385 = vrcp.f32 %v188_v28 }
  0x64   : > { %v384_v29 = vpop.eup %383 }
  0x66   : > { %v386_v30 = vpop.eup %385 }
  0x67   : > { %v195_v31 = vcombine.low %v384_v29, %v386_v30 }
  0x69   : > { %v197_v32 = vmul.f32 %v195_v31, %v153_v0 }
  0x6b   : > { %198 = vst [vmem:[%s150_s18] sm:$0xff] %v197_v32 }
  0x6c   : > { %430 = shalt.err (!%p427_p6)
}
  0x6d   : > { %s431_s15 = scalar_lea.hbm %s642_s3, 128  ;;  %s435_s22 = scalar_lea.hbm %s690_s1, 256 }
  0x6e   : > { %p432_p4 = scmp.ne.s32.totalorder %s642_s3, %s431_s15  ;;  %p436_p1 = scmp.lt.u32.totalorder %s642_s3, %s690_s1 }
  0x6f   : > { %p437_p2 = scmp.lt.u32.totalorder %s435_s22, %s431_s15  ;;  %p439_p8 = scmp.lt.u32.totalorder %s431_s15, %s642_s3 }
  0x70   : > { %p433_p10 = pnand %p432_p4, %p699_p9 }
  0x71   : > { %p438_p5 = por %p437_p2, %p436_p1 }
  0x72   : > { %p434_p12 = pneg %p433_p10 }
  0x73   : > { %p440_p11 = por %p439_p8, %p438_p5 }
  0x75   : > { %p441_p0 = pnand %p440_p11, %p434_p12 }
  0x77   : > { %444 = shalt.err (!%p441_p0)
}
  0x78   : > { %319 = dma.vmem_to_hbm [thread:$0]  (%p699_p9), %s637_s27, 128, %s642_s3, %s200_s4  }
  0x79 PF: > { %s228_s25 = sand.u32 1, %s479_s6   ;;  %p700_p7 = scmp.ne.s32.totalorder %s695_s21, 0 }
  0x7a   : > { %p701_p13 = scmp.ge.s32.totalorder %s499_s11, 2  ;;  %s229_s26 = scalar_lea.sflag [#allocation4], %s228_s25 }
  0x7c   : > { %p326_p3 = pnand %p701_p13, %p700_p7 }
  0x7e   : > { %474 = dma.done.wait (!%p326_p3), %s229_s26, 128  }
  0x7f   : > { %476 = vsyncadd (!%p326_p3), %s229_s26, 4294967168  ;;  %s17_s11 = sadd.s32 1, %s499_s11   ;;  %s702_s6 = smov %s483_s7 }
  0x80   : > { %p14_p6 = scmp.ge.s32.totalorder %s17_s11, 4   ;;  %s703_s7 = smov %s487_s8 }
  0x81   : > { %s704_s8 = smov %s569_s20  ;;  %s705_s9 = smov %s495_s10 }
  0x82   : > { %s706_s10 = smov %s708_s14  ;;  %16 = sbr.rel (!%p14_p6) target bundleno = 6 (0x6), region = 69 }
  0x89   :  { %234 = vsyncpa [#allocation3], 1 }
  0x8a   :  { %236 = vsyncpa [#allocation3 + $0x1], 1 }
  0x8b   :  { %237 = vsyncpa [#allocation4], 1 }
  0x8c   :  { %239 = vsyncpa [#allocation4 + $0x1], 1 }

</bundles_post_ra>
